<compile_context>
chip_gen: v6e
topology: v6e:2x2x1
jax: 0.10.0
libtpu: 0.0.40
codegen_flags: <defaults>
</compile_context>

<pallas_src>
import functools

import jax
import jax.numpy as jnp
from jax.experimental import pallas as pl
from jax.experimental.pallas import tpu as pltpu

HIDDEN = 256
LANE = 128
SUBLANE = 8
MIN_SPLIT_ROWS = 128              # only split the batch grid once it's worth it (v7x 2 TCs)
DEFAULT_TILE_B = 2048             # ~8 MB/step of VMEM -> fits v5e/v6e/v7x with headroom
VMEM_LIMIT_BYTES = 32 * 1024 * 1024


def _round_up(n, m):
    return ((n + m - 1) // m) * m


def _plan_tiles(batch, tile_b_max):
    """Pick (tile_b, padded_batch). Keeps >=2 grid steps for large batches so the
    'parallel' axis shards across both TensorCores on v7x."""
    b_ceil = _round_up(batch, SUBLANE)
    n_tiles = max(pl.cdiv(b_ceil, tile_b_max), 1)
    if n_tiles == 1 and b_ceil >= 2 * MIN_SPLIT_ROWS:
        n_tiles = 2
    tile_b = _round_up(pl.cdiv(b_ceil, n_tiles), SUBLANE)
    return tile_b, tile_b * n_tiles


def dqn_kernel(x_ref, w1_ref, b1_ref, w2_ref, b2_ref, w3_ref, b3_ref, out_ref):
    """state -> 256 relu -> 256 relu -> action tanh; one batch tile per grid step."""
    # Layer 1: f32 x f32 matmul over the tiny, unpadded state_dim contraction
    # (Mosaic pads the partial K tile internally; MXU cost is negligible at K~24).
    h1 = jnp.dot(x_ref[...], w1_ref[...], preferred_element_type=jnp.float32)
    h1 = jnp.maximum(h1 + b1_ref[...], 0.0)
    # Layers 2/3: bf16 MXU operands, f32 accumulation; elementwise kept in f32
    # (v5e has no bf16 VPU/EUP).
    h2 = jnp.dot(h1.astype(jnp.bfloat16), w2_ref[...],
                 preferred_element_type=jnp.float32)
    h2 = jnp.maximum(h2 + b2_ref[...], 0.0)
    h3 = jnp.dot(h2.astype(jnp.bfloat16), w3_ref[...],
                 preferred_element_type=jnp.float32)
    out_ref[...] = jnp.tanh(h3 + b3_ref[...]).astype(out_ref.dtype)   # bf16 writeback


def prepare_params(params):
    """One-time padding/casting so the per-call wrapper does no weight work.
    w3/b3 are zero-padded to a lane-dense 128-wide output; w2/w3 cast to bf16."""
    f32, bf16 = jnp.float32, jnp.bfloat16
    action_dim = params["w3"].shape[1]
    a_pad = _round_up(action_dim, LANE)
    w3 = jnp.zeros((HIDDEN, a_pad), bf16).at[:, :action_dim].set(
        params["w3"].astype(bf16))
    b3 = jnp.zeros((1, a_pad), f32).at[:, :action_dim].set(
        params["b3"].reshape(1, -1).astype(f32))
    return {
        "w1": params["w1"].astype(f32),
        "b1": params["b1"].reshape(1, -1).astype(f32),
        "w2": params["w2"].astype(bf16),
        "b2": params["b2"].reshape(1, -1).astype(f32),
        "w3": w3,
        "b3": b3,
    }


@functools.partial(jax.jit, static_argnames=("action_dim", "tile_b"))
def dq_network_forward(x, prep, action_dim, tile_b=DEFAULT_TILE_B):
    """x: (B, state_dim) f32. prep: output of prepare_params. Returns (B, action_dim) f32."""
    B, state_dim = x.shape
    a_pad = prep["w3"].shape[1]
    tb, b_pad = _plan_tiles(B, tile_b)

    x = x.astype(jnp.float32)
    if b_pad != B:
        x = jnp.pad(x, ((0, b_pad - B), (0, 0)))   # batch pad only when needed

    grid = (b_pad // tb,)
    const = lambda i: (0, 0)   # weights/biases: same block every step (VMEM-resident)

    flops = 2 * b_pad * (state_dim * HIDDEN + HIDDEN * HIDDEN + HIDDEN * a_pad)
    bytes_accessed = (
        b_pad * state_dim * 4 + b_pad * a_pad * 2
        + prep["w1"].size * 4 + prep["b1"].size * 4
        + prep["w2"].size * 2 + prep["b2"].size * 4
        + prep["w3"].size * 2 + prep["b3"].size * 4)

    out = pl.pallas_call(
        dqn_kernel,
        out_shape=jax.ShapeDtypeStruct((b_pad, a_pad), jnp.bfloat16),
        grid_spec=pltpu.PrefetchScalarGridSpec(
            num_scalar_prefetch=0,
            grid=grid,
            in_specs=[
                pl.BlockSpec((tb, state_dim), lambda i: (i, 0)),   # x tile (unpadded lanes)
                pl.BlockSpec((state_dim, HIDDEN), const),          # w1 (resident)
                pl.BlockSpec((1, HIDDEN), const),                  # b1
                pl.BlockSpec((HIDDEN, HIDDEN), const),             # w2
                pl.BlockSpec((1, HIDDEN), const),                  # b2
                pl.BlockSpec((HIDDEN, a_pad), const),              # w3 (lane-dense out)
                pl.BlockSpec((1, a_pad), const),                   # b3
            ],
            out_specs=pl.BlockSpec((tb, a_pad), lambda i: (i, 0)),
        ),
        compiler_params=pltpu.CompilerParams(
            dimension_semantics=("parallel",),
            vmem_limit_bytes=VMEM_LIMIT_BYTES),
        cost_estimate=pl.CostEstimate(
            flops=int(flops),
            transcendentals=int(b_pad * a_pad),
            bytes_accessed=int(bytes_accessed)),
    )(x, prep["w1"], prep["b1"], prep["w2"], prep["b2"], prep["w3"], prep["b3"])

    return out[:B, :action_dim].astype(jnp.float32)


def init_params(key, state_dim, action_dim, hidden=HIDDEN):
    """Mimics PyTorch nn.Linear default init: U[-1/sqrt(fan_in), 1/sqrt(fan_in)].
    Weights stored transposed vs PyTorch: (in_features, out_features)."""
    ks = jax.random.split(key, 6)

    def linear(kw, kb, fan_in, fan_out):
        bound = 1.0 / jnp.sqrt(jnp.float32(fan_in))
        w = jax.random.uniform(kw, (fan_in, fan_out), jnp.float32, -bound, bound)
        b = jax.random.uniform(kb, (1, fan_out), jnp.float32, -bound, bound)
        return w, b

    w1, b1 = linear(ks[0], ks[1], state_dim, hidden)
    w2, b2 = linear(ks[2], ks[3], hidden, hidden)
    w3, b3 = linear(ks[4], ks[5], hidden, action_dim)
    return {"w1": w1, "b1": b1, "w2": w2, "b2": b2, "w3": w3, "b3": b3}


def reference_forward_mixed(x, p):
    """Mirror of the kernel numerics: f32 layer-1, bf16 operands for layers 2/3,
    f32 accumulation / elementwise."""
    f32, bf16 = jnp.float32, jnp.bfloat16
    h1 = jnp.maximum(jnp.dot(x, p["w1"], preferred_element_type=f32) + p["b1"], 0.0)
    h2 = jnp.maximum(
        jnp.dot(h1.astype(bf16), p["w2"].astype(bf16),
                preferred_element_type=f32) + p["b2"], 0.0)
    h3 = jnp.dot(h2.astype(bf16), p["w3"].astype(bf16),
                 preferred_element_type=f32) + p["b3"]
    return jnp.tanh(h3)


def reference_forward_f32(x, p):
    h1 = jnp.maximum(x @ p["w1"] + p["b1"], 0.0)
    h2 = jnp.maximum(h1 @ p["w2"] + p["b2"], 0.0)
    return jnp.tanh(h2 @ p["w3"] + p["b3"])


if __name__ == "__main__":
    key = jax.random.PRNGKey(0)
    k_params, k_x = jax.random.split(key)

    batch = 8
    state_dim = 24   # e.g. BipedalWalker observation size
    action_dim = 4   # e.g. BipedalWalker action size

    params = init_params(k_params, state_dim, action_dim)
    prep = prepare_params(params)           # one-time pad/cast of weights & biases
    x = jax.random.normal(k_x, (batch, state_dim), jnp.float32)

    out = dq_network_forward(x, prep, action_dim)
    out = jax.block_until_ready(out)
    assert out.shape == (batch, action_dim)

    ref_mixed = reference_forward_mixed(x, params)
    ref_f32 = reference_forward_f32(x, params)
    assert jnp.allclose(out, ref_mixed, atol=1e-2, rtol=1e-2)
    assert jnp.allclose(out, ref_f32, atol=5e-2, rtol=5e-2)

    print("KERNEL_OK")
</pallas_src>

<mosaic_0001>
module attributes {stable_mosaic.version = 11 : i64} {
  func.func @dqn_kernel(%arg0: i32, %arg1: memref<8x24xf32, #tpu.memory_space<vmem>>, %arg2: memref<24x256xf32, #tpu.memory_space<vmem>>, %arg3: memref<1x256xf32, #tpu.memory_space<vmem>>, %arg4: memref<256x256xbf16, #tpu.memory_space<vmem>>, %arg5: memref<1x256xf32, #tpu.memory_space<vmem>>, %arg6: memref<256x128xbf16, #tpu.memory_space<vmem>>, %arg7: memref<1x128xf32, #tpu.memory_space<vmem>>, %arg8: memref<8x128xbf16, #tpu.memory_space<vmem>>) attributes {dimension_semantics = [#tpu.dimension_semantics<parallel>], iteration_bounds = array<i64: 1>, scalar_prefetch = 0 : i64, scratch_operands = 0 : i64, tpu.core_type = #tpu.core_type<tc>, window_params = [{transform_indices = @transform_0, window_bounds = array<i64: 8, 24>}, {pipeline_mode = #tpu.pipeline_mode<synchronous>, transform_indices = @transform_1, window_bounds = array<i64: 24, 256>}, {pipeline_mode = #tpu.pipeline_mode<synchronous>, transform_indices = @transform_2, window_bounds = array<i64: 1, 256>}, {pipeline_mode = #tpu.pipeline_mode<synchronous>, transform_indices = @transform_3, window_bounds = array<i64: 256, 256>}, {pipeline_mode = #tpu.pipeline_mode<synchronous>, transform_indices = @transform_4, window_bounds = array<i64: 1, 256>}, {pipeline_mode = #tpu.pipeline_mode<synchronous>, transform_indices = @transform_5, window_bounds = array<i64: 256, 128>}, {pipeline_mode = #tpu.pipeline_mode<synchronous>, transform_indices = @transform_6, window_bounds = array<i64: 1, 128>}, {transform_indices = @transform_7, window_bounds = array<i64: 8, 128>}]} {
    %c0 = arith.constant 0 : index
    %c0_0 = arith.constant 0 : index
    %0 = vector.load %arg1[%c0, %c0_0] : memref<8x24xf32, #tpu.memory_space<vmem>>, vector<8x24xf32>
    %c0_1 = arith.constant 0 : index
    %c0_2 = arith.constant 0 : index
    %1 = vector.load %arg2[%c0_1, %c0_2] : memref<24x256xf32, #tpu.memory_space<vmem>>, vector<24x256xf32>
    %cst = arith.constant dense<0.000000e+00> : vector<8x256xf32>
    %2 = tpu.matmul %0, %1, %cst {dimension_numbers = #tpu.dot_dimension_numbers<[1], [0], [0], [1], [0, 0, 1, 1], [], []>} : vector<8x24xf32>, vector<24x256xf32>, vector<8x256xf32> -> vector<8x256xf32>
    %c0_3 = arith.constant 0 : index
    %c0_4 = arith.constant 0 : index
    %3 = vector.load %arg3[%c0_3, %c0_4] : memref<1x256xf32, #tpu.memory_space<vmem>>, vector<1x256xf32>
    %4 = vector.broadcast %3 : vector<1x256xf32> to vector<8x256xf32>
    %5 = arith.addf %2, %4 : vector<8x256xf32>
    %cst_5 = arith.constant 0.000000e+00 : f32
    %6 = vector.broadcast %cst_5 : f32 to vector<8x256xf32>
    %7 = arith.maximumf %5, %6 : vector<8x256xf32>
    %8 = arith.truncf %7 : vector<8x256xf32> to vector<8x256xbf16>
    %c0_6 = arith.constant 0 : index
    %c0_7 = arith.constant 0 : index
    %9 = vector.load %arg4[%c0_6, %c0_7] : memref<256x256xbf16, #tpu.memory_space<vmem>>, vector<256x256xbf16>
    %cst_8 = arith.constant dense<0.000000e+00> : vector<8x256xf32>
    %10 = tpu.matmul %8, %9, %cst_8 {dimension_numbers = #tpu.dot_dimension_numbers<[1], [0], [0], [1], [0, 0, 1, 1], [], []>} : vector<8x256xbf16>, vector<256x256xbf16>, vector<8x256xf32> -> vector<8x256xf32>
    %c0_9 = arith.constant 0 : index
    %c0_10 = arith.constant 0 : index
    %11 = vector.load %arg5[%c0_9, %c0_10] : memref<1x256xf32, #tpu.memory_space<vmem>>, vector<1x256xf32>
    %12 = vector.broadcast %11 : vector<1x256xf32> to vector<8x256xf32>
    %13 = arith.addf %10, %12 : vector<8x256xf32>
    %cst_11 = arith.constant 0.000000e+00 : f32
    %14 = vector.broadcast %cst_11 : f32 to vector<8x256xf32>
    %15 = arith.maximumf %13, %14 : vector<8x256xf32>
    %16 = arith.truncf %15 : vector<8x256xf32> to vector<8x256xbf16>
    %c0_12 = arith.constant 0 : index
    %c0_13 = arith.constant 0 : index
    %17 = vector.load %arg6[%c0_12, %c0_13] : memref<256x128xbf16, #tpu.memory_space<vmem>>, vector<256x128xbf16>
    %cst_14 = arith.constant dense<0.000000e+00> : vector<8x128xf32>
    %18 = tpu.matmul %16, %17, %cst_14 {dimension_numbers = #tpu.dot_dimension_numbers<[1], [0], [0], [1], [0, 0, 1, 1], [], []>} : vector<8x256xbf16>, vector<256x128xbf16>, vector<8x128xf32> -> vector<8x128xf32>
    %c0_15 = arith.constant 0 : index
    %c0_16 = arith.constant 0 : index
    %19 = vector.load %arg7[%c0_15, %c0_16] : memref<1x128xf32, #tpu.memory_space<vmem>>, vector<1x128xf32>
    %20 = vector.broadcast %19 : vector<1x128xf32> to vector<8x128xf32>
    %21 = arith.addf %18, %20 : vector<8x128xf32>
    %22 = math.tanh %21 : vector<8x128xf32>
    %23 = arith.truncf %22 : vector<8x128xf32> to vector<8x128xbf16>
    %c0_17 = arith.constant 0 : index
    %c0_18 = arith.constant 0 : index
    %24 = vector.load %arg8[%c0_17, %c0_18] : memref<8x128xbf16, #tpu.memory_space<vmem>>, vector<8x128xbf16>
    tpu.vector_store %arg8[%c0_17, %c0_18], %23 {strides = array<i32>} : memref<8x128xbf16, #tpu.memory_space<vmem>>, vector<8x128xbf16>,
    return
  }
  func.func @transform_0(%arg0: i32) -> (i32, i32) {
    %c0_i32 = arith.constant 0 : i32
    %c0_i32_0 = arith.constant 0 : i32
    return %arg0, %c0_i32 : i32, i32
  }
  func.func @transform_1(%arg0: i32) -> (i32, i32) {
    %c0_i32 = arith.constant 0 : i32
    %c0_i32_0 = arith.constant 0 : i32
    %c0_i32_1 = arith.constant 0 : i32
    return %c0_i32, %c0_i32_0 : i32, i32
  }
  func.func @transform_2(%arg0: i32) -> (i32, i32) {
    %c0_i32 = arith.constant 0 : i32
    %c0_i32_0 = arith.constant 0 : i32
    %c0_i32_1 = arith.constant 0 : i32
    return %c0_i32, %c0_i32_0 : i32, i32
  }
  func.func @transform_3(%arg0: i32) -> (i32, i32) {
    %c0_i32 = arith.constant 0 : i32
    %c0_i32_0 = arith.constant 0 : i32
    %c0_i32_1 = arith.constant 0 : i32
    return %c0_i32, %c0_i32_0 : i32, i32
  }
  func.func @transform_4(%arg0: i32) -> (i32, i32) {
    %c0_i32 = arith.constant 0 : i32
    %c0_i32_0 = arith.constant 0 : i32
    %c0_i32_1 = arith.constant 0 : i32
    return %c0_i32, %c0_i32_0 : i32, i32
  }
  func.func @transform_5(%arg0: i32) -> (i32, i32) {
    %c0_i32 = arith.constant 0 : i32
    %c0_i32_0 = arith.constant 0 : i32
    %c0_i32_1 = arith.constant 0 : i32
    return %c0_i32, %c0_i32_0 : i32, i32
  }
  func.func @transform_6(%arg0: i32) -> (i32, i32) {
    %c0_i32 = arith.constant 0 : i32
    %c0_i32_0 = arith.constant 0 : i32
    %c0_i32_1 = arith.constant 0 : i32
    return %c0_i32, %c0_i32_0 : i32, i32
  }
  func.func @transform_7(%arg0: i32) -> (i32, i32) {
    %c0_i32 = arith.constant 0 : i32
    %c0_i32_0 = arith.constant 0 : i32
    return %arg0, %c0_i32 : i32, i32
  }
}

</mosaic_0001>

<bundles_post_ra>
// kernel: dq_network_forward.1
= control target key start
LH: loop header
LB: loop body
LE: loop exit
PB: predicated region body
PF: predicated region fallthrough
CT: control target
= control target key end

     0   :  { %12 = vsyncpa [#allocation3], 0  ;;  %s955_s0 = inlined_call_operand.hbm [shape: f32[8,24], index: 0, kind: input, shape index: {}]   ;;  %s956_s1 = inlined_call_operand.hbm [shape: f32[24,256], index: 1, kind: input, shape index: {}]   ;;  %s957_s2 = inlined_call_operand.hbm [shape: f32[1,256], index: 2, kind: input, shape index: {}]   ;;  %s958_s3 = inlined_call_operand.hbm [shape: bf16[256,256], index: 3, kind: input, shape index: {}]   ;;  %s959_s4 = inlined_call_operand.vmem [shape: f32[1,256], index: 4, kind: input, shape index: {}]   ;;  %s960_s5 = inlined_call_operand.hbm [shape: bf16[256,128], index: 5, kind: input, shape index: {}]   ;;  %s961_s6 = inlined_call_operand.vmem [shape: f32[1,128], index: 6, kind: input, shape index: {}]   ;;  %s962_s7 = inlined_call_operand.vmem [shape: bf16[8,128], index: 7, kind: output, shape index: {}]  }
   0x1   :  { %13 = vsyncpa [#allocation5], 0 }
   0x2   :  { %14 = vsyncpa [#allocation8], 0  ;;  %s879_s24 = smov [#allocation4]  }
   0x3   :  { %s30_s25 = sshll.u32 %s879_s24, 4  ;;  %s31_s25 = int_to_ptr.vmem [resolvable:$true] %s30_s25 }
   0x4   :  { %s781_s26 = scalar_lea.vmem %s31_s25, 768  ;;  %p786_p1 = scmp.lt.s32.totalorder %s31_s25, %s31_s25 }
   0x5   :  { %p782_p0 = scmp.ne.s32.totalorder %s31_s25, %s781_s26  ;;  %p787_p2 = scmp.lt.s32.totalorder %s781_s26, %s781_s26 }
   0x7   :  { %p788_p3 = por %p787_p2, %p786_p1 }
   0x9   :  { %p789_p4 = pnand %p788_p3, %p782_p0 }
   0xb   :  { %792 = shalt.err (!%p789_p4)
}
   0xc   :  { %s880_s27 = smov 256   ;;  %s881_s28 = smov 16  }
   0xd   :  { %36 = dma.hbm_to_vmem [thread:$0]  %s956_s1, 768, %s31_s25, [#allocation5], %s880_s27, %s880_s27, %s881_s28  }
   0xe   :  { %s882_s8 = smov [#allocation7]  }
   0xf   :  { %s52_s9 = sshll.u32 %s882_s8, 4  ;;  %s53_s9 = int_to_ptr.vmem [resolvable:$true] %s52_s9 }
  0x10   :  { %s801_s10 = scalar_lea.vmem %s53_s9, 4096  ;;  %p806_p6 = scmp.lt.s32.totalorder %s53_s9, %s53_s9 }
  0x11   :  { %p802_p5 = scmp.ne.s32.totalorder %s53_s9, %s801_s10  ;;  %p807_p7 = scmp.lt.s32.totalorder %s801_s10, %s801_s10 }
  0x13   :  { %p808_p8 = por %p807_p7, %p806_p6 }
  0x15   :  { %p809_p9 = pnand %p808_p8, %p802_p5 }
  0x17   :  { %812 = shalt.err (!%p809_p9)
}
  0x18   :  { %s883_s11 = smov 128   ;;  %s884_s12 = smov 8  }
  0x19   :  { %58 = dma.hbm_to_vmem [thread:$0]  %s958_s3, 4096, %s53_s9, [#allocation8], %s883_s11, %s883_s11, %s884_s12  }
  0x1a   :  { %s885_s15 = smov [#allocation2]   ;;  %s886_s17 = smov [#allocation6]  }
  0x1b   :  { %s21_s16 = sshll.u32 %s885_s15, 4  ;;  %s43_s1 = sshll.u32 %s886_s17, 4  ;;  %s22_s16 = int_to_ptr.vmem [resolvable:$true] %s21_s16  ;;  %s44_s1 = int_to_ptr.vmem [resolvable:$true] %s43_s1 }
  0x1c   :  { %s821_s18 = scalar_lea.vmem %s22_s16, 128  ;;  %p826_p11 = scmp.lt.s32.totalorder %s22_s16, %s22_s16 }
  0x1d   :  { %p822_p10 = scmp.ne.s32.totalorder %s22_s16, %s821_s18  ;;  %p827_p12 = scmp.lt.s32.totalorder %s821_s18, %s821_s18 }
  0x1f   :  { %p828_p13 = por %p827_p12, %p826_p11 }
  0x21   :  { %p829_p0 = pnand %p828_p13, %p822_p10 }
  0x23   :  { %832 = shalt.err (!%p829_p0)
}
  0x24   :  { %24 = dma.hbm_to_vmem [thread:$0]  %s955_s0, 128, %s22_s16, [#allocation3]  }
  0x25   :  { %s841_s21 = scalar_lea.vmem %s44_s1, 32  ;;  %p846_p2 = scmp.lt.s32.totalorder %s44_s1, %s44_s1 }
  0x26   :  { %p842_p1 = scmp.ne.s32.totalorder %s44_s1, %s841_s21  ;;  %p847_p3 = scmp.lt.s32.totalorder %s841_s21, %s841_s21 }
  0x28   :  { %p848_p4 = por %p847_p3, %p846_p2 }
  0x2a   :  { %p849_p5 = pnand %p848_p4, %p842_p1 }
  0x2c   :  { %852 = shalt.err (!%p849_p5)
}
  0x2d   :  { %46 = dma.hbm_to_vmem [thread:$0]  %s957_s2, 32, %s44_s1, [#allocation5]  }
  0x2e   :  { %s887_s23 = smov [#allocation9]  }
  0x2f   :  { %s66_s24 = sshll.u32 %s887_s23, 4  ;;  %s67_s24 = int_to_ptr.vmem [resolvable:$true] %s66_s24 }
  0x30   :  { %s861_s25 = scalar_lea.vmem %s67_s24, 2048  ;;  %p866_p7 = scmp.lt.s32.totalorder %s67_s24, %s67_s24 }
  0x31   :  { %p862_p6 = scmp.ne.s32.totalorder %s67_s24, %s861_s25  ;;  %p867_p8 = scmp.lt.s32.totalorder %s861_s25, %s861_s25 }
  0x33   :  { %p868_p9 = por %p867_p8, %p866_p7 }
  0x35   :  { %p869_p10 = pnand %p868_p9, %p862_p6 }
  0x37   :  { %872 = shalt.err (!%p869_p10)
}
  0x38   :  { %s888_s0 = smov 64   ;;  %s889_s26 = smov 4  }
  0x39   :  { %72 = dma.hbm_to_vmem [thread:$0]  %s960_s5, 2048, %s67_s24, [#allocation8], %s888_s0, %s888_s0, %s889_s26  }
  0x3a   :  { %873 = dma.done.wait [#allocation3], 128  }
  0x3b   :  { %874 = vsyncadd [#allocation3], 4294967168 }
  0x3c   :  { %875 = dma.done.wait [#allocation5], 800  }
  0x3d   :  { %876 = vsyncadd [#allocation5], 4294966496 }
  0x3e   :  { %877 = dma.done.wait [#allocation8], 6144  }
  0x3f   :  { %878 = vsyncadd [#allocation8], 4294961152  ;;  %v890_v0 = vmov 0.0   ;;  %v97_v1 = vld [vmem:[#allocation4 + $0x28] sm:$0xff]  ;;  %v96_v2 = vld [vmem:[#allocation4 + $0x20] sm:$0xff]  ;;  %vm110_vm0 = vcmask 195584   ;;  %v100_v52 = vlaneseq }
  0x40   :  { %178 = vmatprep.mubr.f32.mxu0 %v890_v0  ;;  %v95_v3 = vld [vmem:[#allocation4 + $0x18] sm:$0xff]  ;;  %140 = vmatprep.subr.mxu0 %v97_v1  ;;  %v94_v4 = vld [vmem:[#allocation4 + $0x10] sm:$0xff]  ;;  %v93_v5 = vld [vmem:[#allocation4 + $0x8] sm:$0xff] }
  0x41   :  { %141 = vmatpush1.msra.mxu0 %v96_v2  ;;  %v92_v6 = vld [vmem:[#allocation4] sm:$0xff]  ;;  %v91_v9 = vld [vmem:[#allocation2] sm:$0xff]  ;;  %v755_v40 = vld [vmem:[#allocation9 + $0x78] sm:$0xff]   ;;  %v101_v53 = vshrl.u32 %v100_v52, 7 }
  0x42   :  { %142 = vmatprep.subr.mxu0 %v95_v3  ;;  %v707_v7 = vld [vmem:[#allocation7 + $0x74] ss:$8 sps:$4 sm:$0xff]   ;;  %v709_v8 = vld [vmem:[#allocation7 + $0x70] ss:$8 sps:$4 sm:$0xff]   ;;  %v710_v10 = vld [vmem:[#allocation7 + $0x64] ss:$8 sps:$4 sm:$0xff]  }
  0x43   :  { %143 = vmatpush1.msra.mxu0 %v94_v4  ;;  %393 = vmatprep.subr.bf16.mxu1 %v707_v7  ;;  %v712_v11 = vld [vmem:[#allocation7 + $0x60] ss:$8 sps:$4 sm:$0xff]   ;;  %v713_v12 = vld [vmem:[#allocation7 + $0x54] ss:$8 sps:$4 sm:$0xff]   ;;  %v715_v13 = vld [vmem:[#allocation7 + $0x50] ss:$8 sps:$4 sm:$0xff]  }
  0x44   :  { %144 = vmatprep.subr.mxu0 %v93_v5  ;;  %394 = vmatpush1.bf16.msra.mxu1 %v709_v8  ;;  %v716_v14 = vld [vmem:[#allocation7 + $0x44] ss:$8 sps:$4 sm:$0xff]   ;;  %v718_v15 = vld [vmem:[#allocation7 + $0x40] ss:$8 sps:$4 sm:$0xff]   ;;  %v719_v16 = vld [vmem:[#allocation7 + $0x34] ss:$8 sps:$4 sm:$0xff]  }
  0x45   :  { %145 = vmatpush1.msra.mxu0 %v92_v6  ;;  %395 = vmatprep.subr.bf16.mxu1 %v710_v10  ;;  %v721_v17 = vld [vmem:[#allocation7 + $0x30] ss:$8 sps:$4 sm:$0xff]   ;;  %v722_v18 = vld [vmem:[#allocation7 + $0x24] ss:$8 sps:$4 sm:$0xff]   ;;  %v724_v19 = vld [vmem:[#allocation7 + $0x20] ss:$8 sps:$4 sm:$0xff]  }
  0x46   :  { %623 = vmatmul.mubr.msk.f32.vlgmr.msra.gmra.mxu0 %vm110_vm0, %v91_v9  ;;  %v725_v20 = vld [vmem:[#allocation7 + $0x14] ss:$8 sps:$4 sm:$0xff]   ;;  %v727_v21 = vld [vmem:[#allocation7 + $0x10] ss:$8 sps:$4 sm:$0xff]   ;;  %v728_v22 = vld [vmem:[#allocation7 + $0x4] ss:$8 sps:$4 sm:$0xff]   ;;  %673 = vmatprep.subr.bf16.mxu0 %v755_v40 }
  0x47   :  { %v730_v23 = vld [vmem:[#allocation7] ss:$8 sps:$4 sm:$0xff]   ;;  %v731_v24 = vld [vmem:[#allocation7 + $0xf4] ss:$8 sps:$4 sm:$0xff]   ;;  %v733_v25 = vld [vmem:[#allocation7 + $0xf0] ss:$8 sps:$4 sm:$0xff]  }
  0x48   :  { %396 = vmatpush1.bf16.msra.mxu1 %v712_v11  ;;  %v734_v26 = vld [vmem:[#allocation7 + $0xe4] ss:$8 sps:$4 sm:$0xff]   ;;  %v736_v27 = vld [vmem:[#allocation7 + $0xe0] ss:$8 sps:$4 sm:$0xff]   ;;  %v737_v28 = vld [vmem:[#allocation7 + $0xd4] ss:$8 sps:$4 sm:$0xff]  }
  0x49   :  { %397 = vmatprep.subr.bf16.mxu1 %v713_v12  ;;  %v739_v29 = vld [vmem:[#allocation7 + $0xd0] ss:$8 sps:$4 sm:$0xff]   ;;  %v740_v30 = vld [vmem:[#allocation7 + $0xc4] ss:$8 sps:$4 sm:$0xff]   ;;  %v742_v31 = vld [vmem:[#allocation7 + $0xc0] ss:$8 sps:$4 sm:$0xff]  }
  0x4a   :  { %v743_v32 = vld [vmem:[#allocation7 + $0xb4] ss:$8 sps:$4 sm:$0xff]   ;;  %v745_v33 = vld [vmem:[#allocation7 + $0xb0] ss:$8 sps:$4 sm:$0xff]   ;;  %v746_v34 = vld [vmem:[#allocation7 + $0xa4] ss:$8 sps:$4 sm:$0xff]  }
  0x4b   :  { %v748_v35 = vld [vmem:[#allocation7 + $0xa0] ss:$8 sps:$4 sm:$0xff]   ;;  %v749_v36 = vld [vmem:[#allocation7 + $0x94] ss:$8 sps:$4 sm:$0xff]   ;;  %v751_v37 = vld [vmem:[#allocation7 + $0x90] ss:$8 sps:$4 sm:$0xff]  }
  0x4c   :  { %398 = vmatpush1.bf16.msra.mxu1 %v715_v13  ;;  %v752_v38 = vld [vmem:[#allocation7 + $0x84] ss:$8 sps:$4 sm:$0xff]   ;;  %v754_v39 = vld [vmem:[#allocation7 + $0x80] ss:$8 sps:$4 sm:$0xff]   ;;  %v756_v41 = vld [vmem:[#allocation9 + $0x38] sm:$0xff]   ;;  %v102_v54 = vsub.s32 0, %v101_v53 }
  0x4d   :  { %399 = vmatprep.subr.bf16.mxu1 %v716_v14  ;;  %v757_v42 = vld [vmem:[#allocation9 + $0x70] sm:$0xff]   ;;  %674 = vmatpush3.bf16.msra.mxu0 %v756_v41  ;;  %v759_v44 = vld [vmem:[#allocation9 + $0x68] sm:$0xff]   ;;  %v761_v46 = vld [vmem:[#allocation9 + $0x60] sm:$0xff]   ;;  %v106_v56 = vsub.s32 1, %v101_v53 }
  0x4e   :  { %v758_v43 = vld [vmem:[#allocation9 + $0x30] sm:$0xff]   ;;  %675 = vmatprep.subr.bf16.mxu0 %v757_v42  ;;  %v760_v45 = vld [vmem:[#allocation9 + $0x28] sm:$0xff]   ;;  %v762_v47 = vld [vmem:[#allocation9 + $0x20] sm:$0xff]  }
  0x4f   :  { %v763_v48 = vld [vmem:[#allocation9 + $0x58] sm:$0xff]   ;;  %v765_v50 = vld [vmem:[#allocation9 + $0x50] sm:$0xff]   ;;  %v767_v3 = vld [vmem:[#allocation9 + $0x48] sm:$0xff]  }
  0x50   :  { %400 = vmatpush1.bf16.msra.mxu1 %v718_v15  ;;  %v764_v49 = vld [vmem:[#allocation9 + $0x18] sm:$0xff]   ;;  %v766_v51 = vld [vmem:[#allocation9 + $0x10] sm:$0xff]   ;;  %v768_v4 = vld [vmem:[#allocation9 + $0x8] sm:$0xff]  }
  0x51   :  { %401 = vmatprep.subr.bf16.mxu1 %v719_v16  ;;  %676 = vmatpush3.bf16.msra.mxu0 %v758_v43  ;;  %v98_v55 = vld [vmem:[#allocation6] sm:$0x3]  ;;  %v769_v5 = vld [vmem:[#allocation9 + $0x40] sm:$0xff]  }
  0x52   :  { %677 = vmatprep.subr.bf16.mxu0 %v759_v44  ;;  %v103_v57 = vrot.slane %v98_v55, %v102_v54  ;;  %v107_v58 = vrot.slane %v98_v55, %v106_v56  ;;  %v770_v6 = vld [vmem:[#allocation9] sm:$0xff]  }
  0x53   :  { %v221_v7 = vld [vmem:[%s959_s4] sm:$0x3] }
  0x54   :  { %402 = vmatpush1.bf16.msra.mxu1 %v721_v17  ;;  %v226_v8 = vrot.slane %v221_v7, %v102_v54  ;;  %v230_v9 = vrot.slane %v221_v7, %v106_v56 }
  0x55   :  { %403 = vmatprep.subr.bf16.mxu1 %v722_v18  ;;  %678 = vmatpush3.bf16.msra.mxu0 %v760_v45 }
  0x56   :  { %679 = vmatprep.subr.bf16.mxu0 %v761_v46 }
  0x58   :  { %404 = vmatpush1.bf16.msra.mxu1 %v724_v19 }
  0x59   :  { %405 = vmatprep.subr.bf16.mxu1 %v725_v20  ;;  %680 = vmatpush3.bf16.msra.mxu0 %v762_v47 }
  0x5a   :  { %681 = vmatprep.subr.bf16.mxu0 %v763_v48 }
  0x5c   :  { %406 = vmatpush1.bf16.msra.mxu1 %v727_v21  ;;  %v656_v21 = vld [vmem:[%s961_s6] ss:$0 sm:$0xff] }
  0x5d   :  { %407 = vmatprep.subr.bf16.mxu1 %v728_v22  ;;  %682 = vmatpush3.bf16.msra.mxu0 %v764_v49 }
  0x5e   :  { %683 = vmatprep.subr.bf16.mxu0 %v765_v50 }
  0x60   :  { %408 = vmatpush1.bf16.msra.mxu1 %v730_v23 }
  0x61   :  { %409 = vmatprep.subr.bf16.mxu1 %v731_v24  ;;  %684 = vmatpush3.bf16.msra.mxu0 %v766_v51 }
  0x62   :  { %685 = vmatprep.subr.bf16.mxu0 %v767_v3 }
  0x64   :  { %410 = vmatpush2.bf16.msra.mxu1 %v733_v25 }
  0x65   :  { %411 = vmatprep.subr.bf16.mxu1 %v734_v26  ;;  %686 = vmatpush3.bf16.msra.mxu0 %v768_v4 }
  0x66   :  { %687 = vmatprep.subr.bf16.mxu0 %v769_v5 }
  0x68   :  { %412 = vmatpush2.bf16.msra.mxu1 %v736_v27 }
  0x69   :  { %413 = vmatprep.subr.bf16.mxu1 %v737_v28  ;;  %688 = vmatpush3.bf16.msra.mxu0 %v770_v6 }
  0x6c   :  { %414 = vmatpush2.bf16.msra.mxu1 %v739_v29 }
  0x6d   :  { %415 = vmatprep.subr.bf16.mxu1 %v740_v30 }
  0x70   :  { %416 = vmatpush2.bf16.msra.mxu1 %v742_v31 }
  0x71   :  { %417 = vmatprep.subr.bf16.mxu1 %v743_v32 }
  0x74   :  { %418 = vmatpush2.bf16.msra.mxu1 %v745_v33 }
  0x75   :  { %419 = vmatprep.subr.bf16.mxu1 %v746_v34 }
  0x78   :  { %420 = vmatpush2.bf16.msra.mxu1 %v748_v35 }
  0x79   :  { %421 = vmatprep.subr.bf16.mxu1 %v749_v36 }
  0x7c   :  { %422 = vmatpush2.bf16.msra.mxu1 %v751_v37 }
  0x7d   :  { %423 = vmatprep.subr.bf16.mxu1 %v752_v38 }
  0x80   :  { %424 = vmatpush2.bf16.msra.mxu1 %v754_v39 }
 0x106   :  { %v180_v59 = vpop.f32.mrf.mxu0 }
 0x107   :  { %v181_v60 = vadd.f32 %v180_v59, %v103_v57 }
 0x108   :  { %v182_v61 = vpop.f32.mrf.mxu0 }
 0x109   :  { %v183_v62 = vadd.f32 %v182_v61, %v107_v58  ;;  %v185_v63 = vmax.f32 %v181_v60, 0.0 }
 0x10b   :  { %v186_v0 = vmax.f32 %v183_v62, 0.0  ;;  %v187_v2 = vpack.c.bf16 %v185_v63, %v185_v63 }
 0x10d   :  { %v188_v1 = vpack.c.bf16 %v186_v0, %v186_v0 }
 0x10f   :  { %425 = vmatprep.mubr.bf16.mxu1 %v188_v1 }
 0x110   :  { %426 = vmatmul.mubr.bf16.vlgmr.msra.gmra.mxu1 %v187_v2 }
 0x1d0   :  { %v427_v10 = vpop.f32.mrf.mxu1 }
 0x1d1   :  { %v428_v11 = vadd.f32 %v427_v10, %v226_v8 }
 0x1d2   :  { %v429_v12 = vpop.f32.mrf.mxu1 }
 0x1d3   :  { %v430_v13 = vadd.f32 %v429_v12, %v230_v9  ;;  %v434_v14 = vmax.f32 %v428_v11, 0.0 }
 0x1d4   :  { %v431_v15 = vpop.f32.mrf.mxu1 }
 0x1d5   :  { %v435_v16 = vmax.f32 %v430_v13, 0.0  ;;  %v436_v19 = vpack.c.bf16 %v434_v14, %v434_v14 }
 0x1d6   :  { %v432_v17 = vpop.f32.mrf.mxu1 }
 0x1d7   :  { %v437_v18 = vpack.c.bf16 %v435_v16, %v435_v16 }
 0x1d9   :  { %605 = vmatprep.mubr.bf16.mxu0 %v437_v18 }
 0x1da   :  { %606 = vmatmul.mubr.bf16.vlgmr.msra.gmra.mxu0 %v436_v19 }
 0x29a   :  { %v689_v20 = vpop.f32.mrf.mxu0 }
 0x29c   :  { %v690_v22 = vpop.f32.mrf.mxu0 }
 0x29d   :  { %v691_v23 = vadd.f32 %v690_v22, %v689_v20 }
 0x29e   :  { %v692_v24 = vpop.f32.mrf.mxu0 }
 0x29f   :  { %v608_v25 = vadd.f32 %v691_v23, %v656_v21 }
 0x2a0   :  { %v693_v26 = vpop.f32.mrf.mxu0 }
 0x2a1   :  { %771 = vtanh.f32 %v608_v25 }
 0x2ae   :  { %v772_v27 = vpop.eup %771 }
 0x2af   :  { %v614_v28 = vpack.c.bf16 %v772_v27, %v772_v27 }
 0x2b1   :  { %615 = vst [vmem:[%s962_s7] sm:$0xf] %v614_v28 }
 0x2b2   :  { %620 = vsyncpa [#allocation3], 1 }
 0x2b3   :  { %621 = vsyncpa [#allocation5], 1 }
 0x2b4   :  { %622 = vsyncpa [#allocation8], 1 }

</bundles_post_ra>
